<compile_context>
chip_gen: v7x
topology: tpu7x:2x2x1
jax: 0.10.0
libtpu: 0.0.40
codegen_flags: <defaults>
</compile_context>

<pallas_src>
import functools

import jax
import jax.numpy as jnp
import numpy as np
from jax.experimental import pallas as pl
from jax.experimental.pallas import tpu as pltpu

LN_EPS = 1e-5
# Point-axis tile.  Large enough to amortise per-grid-step overhead (~0.35us) and give
# the MXU a full-height M-dim, small enough to leave >=2 "parallel" grid steps for
# v7x's 2 TensorCores at these sizes; VMEM use per step is <1 MiB so this can be raised
# further (512-1024) on v5e/v6e for bigger point clouds.
MAX_TILE_ROWS = 256


# -----------------------------------------------------------------------------
# helpers
# -----------------------------------------------------------------------------
def _choose_tile(n, max_tile=MAX_TILE_ROWS):
    """Return (tile_rows, padded_rows); small inputs use one full-array block."""
    if n <= max_tile:
        return n, n
    padded = ((n + max_tile - 1) // max_tile) * max_tile
    return max_tile, padded


def _pad_rows(x, rows):
    pad = rows - x.shape[0]
    if pad:
        x = jnp.pad(x, ((0, pad),) + ((0, 0),) * (x.ndim - 1))
    return x


def _layernorm_stats(x, eps):
    """(x - mean) * rsqrt(var + eps)  — gamma/beta are folded into the matmul weights."""
    mu = jnp.mean(x, axis=-1, keepdims=True)
    xc = x - mu
    var = jnp.mean(xc * xc, axis=-1, keepdims=True)
    return xc * jax.lax.rsqrt(var + eps)


# -----------------------------------------------------------------------------
# Pallas kernels
# -----------------------------------------------------------------------------
def _ln_linear_kernel(x_ref, w_ref, b_ref, o_ref, *, eps):
    # y = LayerNorm(x) @ W' + b'   (LN affine pre-folded into W', b')
    xn = _layernorm_stats(x_ref[...], eps)
    o_ref[...] = (
        jnp.dot(xn, w_ref[...], preferred_element_type=jnp.float32) + b_ref[...]
    )


def _upsample_kernel(sf_ref, g_ref, d_ref, w_ref, b_ref, o_ref, *, eps):
    # dense branch: LayerNorm + Linear (LN affine pre-folded into w/b)
    xn = _layernorm_stats(sf_ref[...], eps)
    y1 = jnp.dot(xn, w_ref[...], preferred_element_type=jnp.float32) + b_ref[...]

    # inverse-distance weights over the k nearest coarse points, shape [tn, k, 1]
    # (matches pointops.interpolation: w_i = (1/(d_i+1e-8)) / sum_j 1/(d_j+1e-8))
    dr = 1.0 / (d_ref[...] + 1e-8)
    wts = dr / jnp.sum(dr, axis=1, keepdims=True)

    # weighted aggregation of the gathered coarse features: broadcast-multiply + sum
    # over the neighbour axis (no jnp.tile, no in-kernel reshapes).
    interp = jnp.sum(g_ref[...] * wts, axis=1)            # [tn, c]

    o_ref[...] = y1 + interp


# -----------------------------------------------------------------------------
# wrappers
# -----------------------------------------------------------------------------
def ln_linear(x, w_folded, b_folded, *, eps=LN_EPS):
    """y = LayerNorm(x) @ W' + b'  (LN gamma/beta already folded into W', b')."""
    n, cin = x.shape
    cout = w_folded.shape[1]
    tn, n_pad = _choose_tile(n)
    x_p = _pad_rows(x, n_pad)
    out = pl.pallas_call(
        functools.partial(_ln_linear_kernel, eps=eps),
        out_shape=jax.ShapeDtypeStruct((n_pad, cout), jnp.float32),
        grid=(n_pad // tn,),
        in_specs=[
            pl.BlockSpec((tn, cin), lambda i: (i, 0)),
            pl.BlockSpec((cin, cout), lambda i: (0, 0)),
            pl.BlockSpec((1, cout), lambda i: (0, 0)),
        ],
        out_specs=pl.BlockSpec((tn, cout), lambda i: (i, 0)),
        compiler_params=pltpu.CompilerParams(dimension_semantics=("parallel",)),
    )(x_p, w_folded, b_folded.reshape(1, cout))
    return out[:n]


def upsample_fused(support_feats, gathered, dist, w_folded, b_folded, *, eps=LN_EPS):
    """LayerNorm+Linear on the dense features plus inverse-distance aggregation of the
    gathered coarse features and the final add — one fused kernel over the point axis."""
    n, cout = support_feats.shape
    k = gathered.shape[1]
    tn, n_pad = _choose_tile(n)
    sf_p = _pad_rows(support_feats, n_pad)
    g_p = _pad_rows(gathered, n_pad)
    d_p = _pad_rows(dist[:, :, None], n_pad)               # [n_pad, k, 1]
    out = pl.pallas_call(
        functools.partial(_upsample_kernel, eps=eps),
        out_shape=jax.ShapeDtypeStruct((n_pad, cout), jnp.float32),
        grid=(n_pad // tn,),
        in_specs=[
            pl.BlockSpec((tn, cout), lambda i: (i, 0)),
            pl.BlockSpec((tn, k, cout), lambda i: (i, 0, 0)),
            pl.BlockSpec((tn, k, 1), lambda i: (i, 0, 0)),
            pl.BlockSpec((cout, cout), lambda i: (0, 0)),
            pl.BlockSpec((1, cout), lambda i: (0, 0)),
        ],
        out_specs=pl.BlockSpec((tn, cout), lambda i: (i, 0)),
        compiler_params=pltpu.CompilerParams(dimension_semantics=("parallel",)),
    )(sf_p, g_p, d_p, w_folded, b_folded.reshape(1, cout))
    return out[:n]


# -----------------------------------------------------------------------------
# JAX glue: batched kNN (pointops.knnquery equivalent)
# -----------------------------------------------------------------------------
def knn_with_offsets(src_xyz, src_offset, tgt_xyz, tgt_offset, k):
    """For every target point, the k nearest source points within the same batch
    segment (offsets are cumulative point counts, pointops convention)."""
    m, n = src_xyz.shape[0], tgt_xyz.shape[0]
    src_batch = jnp.searchsorted(src_offset, jnp.arange(m), side="right")
    tgt_batch = jnp.searchsorted(tgt_offset, jnp.arange(n), side="right")
    d2 = jnp.sum((tgt_xyz[:, None, :] - src_xyz[None, :, :]) ** 2, axis=-1)  # [n, m]
    d2 = jnp.where(tgt_batch[:, None] != src_batch[None, :], jnp.inf, d2)
    neg_d2, idx = jax.lax.top_k(-d2, k)
    dist = jnp.sqrt(jnp.maximum(-neg_d2, 0.0))             # knnquery returns sqrt(d2)
    return idx, dist


# -----------------------------------------------------------------------------
# parameters (PyTorch-style raw params + LN-affine-folded weights for the kernels)
# -----------------------------------------------------------------------------
def init_upsample_params(key, in_channels, out_channels):
    ks = jax.random.split(key, 8)

    def linear_init(kw, kb, fin, fout):
        bound = 1.0 / np.sqrt(fin)
        w = jax.random.uniform(kw, (fin, fout), jnp.float32, -bound, bound)
        b = jax.random.uniform(kb, (fout,), jnp.float32, -bound, bound)
        return w, b

    # linear1: LayerNorm(out_channels) -> Linear(out_channels, out_channels)
    g1 = 1.0 + 0.1 * jax.random.normal(ks[0], (out_channels,), jnp.float32)
    be1 = 0.1 * jax.random.normal(ks[1], (out_channels,), jnp.float32)
    w1, bl1 = linear_init(ks[2], ks[3], out_channels, out_channels)
    # linear2: LayerNorm(in_channels) -> Linear(in_channels, out_channels)
    g2 = 1.0 + 0.1 * jax.random.normal(ks[4], (in_channels,), jnp.float32)
    be2 = 0.1 * jax.random.normal(ks[5], (in_channels,), jnp.float32)
    w2, bl2 = linear_init(ks[6], ks[7], in_channels, out_channels)

    def fold(gamma, beta, w, b):
        # LayerNorm gamma/beta folded into the following Linear (free at prep time).
        return gamma[:, None] * w, beta @ w + b

    w1f, b1f = fold(g1, be1, w1, bl1)
    w2f, b2f = fold(g2, be2, w2, bl2)
    raw = dict(g1=g1, be1=be1, w1=w1, bl1=bl1, g2=g2, be2=be2, w2=w2, bl2=bl2)
    folded = dict(w1=w1f, b1=b1f, w2=w2f, b2=b2f)
    return raw, folded


# -----------------------------------------------------------------------------
# forward
# -----------------------------------------------------------------------------
def upsample_forward(folded, pxo1, pxo2, k=3):
    """Pallas-accelerated Upsample.forward (pointops.interpolation default k=3)."""
    support_xyz, support_feats, support_offset = pxo1
    xyz, feats, offset = pxo2

    y2 = ln_linear(feats, folded["w2"], folded["b2"])                    # [M, C_out]
    idx, dist = knn_with_offsets(xyz, offset, support_xyz, support_offset, k)
    # TODO(synk): data-dependent row gather done in plain JAX; a Pallas scalar-prefetch /
    # manual-DMA gather is out of scope here.
    gathered = y2[idx]                                                   # [N, k, C_out]

    # NOTE: bf16 operand casting for the matmuls (keeping f32 accumulation) is a further
    # option on v6e/v7x; kept f32 here to preserve the PyTorch module's numerics.
    return upsample_fused(support_feats, gathered, dist, folded["w1"], folded["b1"])


# -----------------------------------------------------------------------------
# pure-JAX reference (for correctness check)
# -----------------------------------------------------------------------------
def _layernorm_ref(x, gamma, beta, eps=LN_EPS):
    mu = jnp.mean(x, axis=-1, keepdims=True)
    var = jnp.mean((x - mu) ** 2, axis=-1, keepdims=True)
    return (x - mu) / jnp.sqrt(var + eps) * gamma + beta


def upsample_ref(raw, pxo1, pxo2, k=3):
    support_xyz, support_feats, support_offset = pxo1
    xyz, feats, offset = pxo2
    y1 = _layernorm_ref(support_feats, raw["g1"], raw["be1"]) @ raw["w1"] + raw["bl1"]
    y2 = _layernorm_ref(feats, raw["g2"], raw["be2"]) @ raw["w2"] + raw["bl2"]
    idx, dist = knn_with_offsets(xyz, offset, support_xyz, support_offset, k)
    dr = 1.0 / (dist + 1e-8)
    w = dr / jnp.sum(dr, axis=-1, keepdims=True)
    return y1 + jnp.sum(y2[idx] * w[:, :, None], axis=1)


# -----------------------------------------------------------------------------
if __name__ == "__main__":
    key = jax.random.PRNGKey(0)
    k_sx, k_sf, k_x, k_f, k_p = jax.random.split(key, 5)

    IN_CH, OUT_CH = 256, 128           # coarse / dense feature widths (lane-dense)
    N, M = 512, 128                    # dense (support) / coarse point counts
    support_offset = jnp.array([N // 2, N], dtype=jnp.int32)   # 2 batch segments
    offset = jnp.array([M // 2, M], dtype=jnp.int32)

    support_xyz = jax.random.normal(k_sx, (N, 3), jnp.float32)
    support_feats = jax.random.normal(k_sf, (N, OUT_CH), jnp.float32)
    xyz = jax.random.normal(k_x, (M, 3), jnp.float32)
    feats = jax.random.normal(k_f, (M, IN_CH), jnp.float32)

    raw, folded = init_upsample_params(k_p, IN_CH, OUT_CH)

    pxo1 = (support_xyz, support_feats, support_offset)
    pxo2 = (xyz, feats, offset)

    out = upsample_forward(folded, pxo1, pxo2)
    out = jax.block_until_ready(out)
    assert out.shape == (N, OUT_CH) and out.dtype == jnp.float32

    ref = jax.block_until_ready(upsample_ref(raw, pxo1, pxo2))
    np.testing.assert_allclose(np.asarray(out), np.asarray(ref), rtol=2e-2, atol=2e-2)
    print("KERNEL_OK")
</pallas_src>

<mosaic_0001>
module attributes {stable_mosaic.version = 11 : i64} {
  func.func @_ln_linear_kernel(%arg0: i32, %arg1: memref<128x256xf32, #tpu.memory_space<vmem>>, %arg2: memref<256x128xf32, #tpu.memory_space<vmem>>, %arg3: memref<1x128xf32, #tpu.memory_space<vmem>>, %arg4: memref<128x128xf32, #tpu.memory_space<vmem>>) attributes {dimension_semantics = [#tpu.dimension_semantics<parallel>], iteration_bounds = array<i64: 1>, scalar_prefetch = 0 : i64, scratch_operands = 0 : i64, tpu.core_type = #tpu.core_type<tc>, window_params = [{transform_indices = @transform_0, window_bounds = array<i64: 128, 256>}, {pipeline_mode = #tpu.pipeline_mode<synchronous>, transform_indices = @transform_1, window_bounds = array<i64: 256, 128>}, {pipeline_mode = #tpu.pipeline_mode<synchronous>, transform_indices = @transform_2, window_bounds = array<i64: 1, 128>}, {transform_indices = @transform_3, window_bounds = array<i64: 128, 128>}]} {
    %c0 = arith.constant 0 : index
    %c0_0 = arith.constant 0 : index
    %0 = vector.load %arg1[%c0, %c0_0] : memref<128x256xf32, #tpu.memory_space<vmem>>, vector<128x256xf32>
    %cst = arith.constant dense<0.000000e+00> : vector<128xf32>
    %1 = vector.multi_reduction <add>, %0, %cst [1] : vector<128x256xf32> to vector<128xf32>
    %2 = vector.shape_cast %1 : vector<128xf32> to vector<128x1xf32>
    %cst_1 = arith.constant 2.560000e+02 : f32
    %3 = vector.broadcast %cst_1 : f32 to vector<128x1xf32>
    %4 = arith.divf %2, %3 : vector<128x1xf32>
    %5 = vector.broadcast %4 : vector<128x1xf32> to vector<128x256xf32>
    %6 = arith.subf %0, %5 : vector<128x256xf32>
    %7 = arith.mulf %6, %6 : vector<128x256xf32>
    %cst_2 = arith.constant dense<0.000000e+00> : vector<128xf32>
    %8 = vector.multi_reduction <add>, %7, %cst_2 [1] : vector<128x256xf32> to vector<128xf32>
    %9 = vector.shape_cast %8 : vector<128xf32> to vector<128x1xf32>
    %cst_3 = arith.constant 2.560000e+02 : f32
    %10 = vector.broadcast %cst_3 : f32 to vector<128x1xf32>
    %11 = arith.divf %9, %10 : vector<128x1xf32>
    %cst_4 = arith.constant 9.99999974E-6 : f32
    %12 = vector.broadcast %cst_4 : f32 to vector<128x1xf32>
    %13 = arith.addf %11, %12 : vector<128x1xf32>
    %14 = math.rsqrt %13 : vector<128x1xf32>
    %15 = vector.broadcast %14 : vector<128x1xf32> to vector<128x256xf32>
    %16 = arith.mulf %6, %15 : vector<128x256xf32>
    %c0_5 = arith.constant 0 : index
    %c0_6 = arith.constant 0 : index
    %17 = vector.load %arg2[%c0_5, %c0_6] : memref<256x128xf32, #tpu.memory_space<vmem>>, vector<256x128xf32>
    %cst_7 = arith.constant dense<0.000000e+00> : vector<128x128xf32>
    %18 = tpu.matmul %16, %17, %cst_7 {dimension_numbers = #tpu.dot_dimension_numbers<[1], [0], [0], [1], [0, 0, 1, 1], [], []>} : vector<128x256xf32>, vector<256x128xf32>, vector<128x128xf32> -> vector<128x128xf32>
    %c0_8 = arith.constant 0 : index
    %c0_9 = arith.constant 0 : index
    %19 = vector.load %arg3[%c0_8, %c0_9] : memref<1x128xf32, #tpu.memory_space<vmem>>, vector<1x128xf32>
    %20 = vector.broadcast %19 : vector<1x128xf32> to vector<128x128xf32>
    %21 = arith.addf %18, %20 : vector<128x128xf32>
    %c0_10 = arith.constant 0 : index
    %c0_11 = arith.constant 0 : index
    %22 = vector.load %arg4[%c0_10, %c0_11] : memref<128x128xf32, #tpu.memory_space<vmem>>, vector<128x128xf32>
    tpu.vector_store %arg4[%c0_10, %c0_11], %21 {strides = array<i32>} : memref<128x128xf32, #tpu.memory_space<vmem>>, vector<128x128xf32>,
    return
  }
  func.func @transform_0(%arg0: i32) -> (i32, i32) {
    %c0_i32 = arith.constant 0 : i32
    %c0_i32_0 = arith.constant 0 : i32
    return %arg0, %c0_i32 : i32, i32
  }
  func.func @transform_1(%arg0: i32) -> (i32, i32) {
    %c0_i32 = arith.constant 0 : i32
    %c0_i32_0 = arith.constant 0 : i32
    %c0_i32_1 = arith.constant 0 : i32
    return %c0_i32, %c0_i32_0 : i32, i32
  }
  func.func @transform_2(%arg0: i32) -> (i32, i32) {
    %c0_i32 = arith.constant 0 : i32
    %c0_i32_0 = arith.constant 0 : i32
    %c0_i32_1 = arith.constant 0 : i32
    return %c0_i32, %c0_i32_0 : i32, i32
  }
  func.func @transform_3(%arg0: i32) -> (i32, i32) {
    %c0_i32 = arith.constant 0 : i32
    %c0_i32_0 = arith.constant 0 : i32
    return %arg0, %c0_i32 : i32, i32
  }
}

</mosaic_0001>

<bundles_post_ra>
// kernel: tpu_custom_call.1
= control target key start
LH: loop header
LB: loop body
LE: loop exit
PB: predicated region body
PF: predicated region fallthrough
CT: control target
= control target key end

     0   :  { %8 = vsyncpa [#allocation3], 0  ;;  %s1168_s0 = inlined_call_operand.hbm [shape: f32[128,256], index: 0, kind: input, shape index: {}]   ;;  %s1169_s1 = inlined_call_operand.hbm [shape: f32[256,128], index: 1, kind: input, shape index: {}]   ;;  %s1170_s2 = inlined_call_operand.vmem [shape: f32[1,128], index: 2, kind: input, shape index: {}]   ;;  %s1171_s3 = inlined_call_operand.hbm [shape: f32[128,128], index: 3, kind: output, shape index: {}]  }
   0x1   :  { %9 = vsyncpa [#allocation6], 0 }
   0x2   :  { %10 = vsyncpa [#allocation4], 0  ;;  %s790_s12 = smov [#allocation2]   ;;  %s718_s16 = scalar_lea.hbm %s1168_s0, 4096 }
   0x3   :  { %s16_s13 = sshll.u32 %s790_s12, 4  ;;  %p719_p0 = scmp.ne.s32.totalorder %s1168_s0, %s718_s16  ;;  %s17_s13 = int_to_ptr.vmem [resolvable:$true] %s16_s13 }
   0x4   :  { %p722_p1 = scmp.lt.u32.totalorder %s718_s16, %s1168_s0 }
   0x6   :  { %p724_p2 = pnand %p722_p1, %p719_p0 }
   0x8   :  { %727 = shalt.err (!%p724_p2)
}
   0x9   :  { %s728_s21 = scalar_lea.vmem %s17_s13, 4096  ;;  %p733_p4 = scmp.lt.s32.totalorder %s17_s13, %s17_s13 }
   0xa   :  { %p729_p3 = scmp.ne.s32.totalorder %s17_s13, %s728_s21  ;;  %p734_p5 = scmp.lt.s32.totalorder %s728_s21, %s728_s21 }
   0xc   :  { %p735_p6 = por %p734_p5, %p733_p4 }
   0xe   :  { %p736_p7 = pnand %p735_p6, %p729_p3 }
  0x10   :  { %739 = shalt.err (!%p736_p7)
}
  0x11   :  { %s791_s22 = smov 256   ;;  %s792_s23 = smov 16  }
  0x12   :  { %22 = dma.hbm_to_vmem [thread:$0]  %s1168_s0, 4096, %s17_s13, [#allocation3], %s791_s22, %s791_s22, %s792_s23  }
  0x13   :  { %s793_s26 = smov [#allocation5]   ;;  %s740_s30 = scalar_lea.hbm %s1169_s1, 4096 }
  0x14   :  { %s28_s27 = sshll.u32 %s793_s26, 4  ;;  %p741_p8 = scmp.ne.s32.totalorder %s1169_s1, %s740_s30  ;;  %s29_s27 = int_to_ptr.vmem [resolvable:$true] %s28_s27 }
  0x15   :  { %p744_p9 = scmp.lt.u32.totalorder %s740_s30, %s1169_s1 }
  0x17   :  { %p746_p10 = pnand %p744_p9, %p741_p8 }
  0x19   :  { %749 = shalt.err (!%p746_p10)
}
  0x1a   :  { %s750_s8 = scalar_lea.vmem %s29_s27, 4096  ;;  %p755_p12 = scmp.lt.s32.totalorder %s29_s27, %s29_s27 }
  0x1b   :  { %p751_p11 = scmp.ne.s32.totalorder %s29_s27, %s750_s8  ;;  %p756_p13 = scmp.lt.s32.totalorder %s750_s8, %s750_s8 }
  0x1d   :  { %p757_p0 = por %p756_p13, %p755_p12 }
  0x1f   :  { %p758_p1 = pnand %p757_p0, %p751_p11 }
  0x21   :  { %761 = shalt.err (!%p758_p1)
}
  0x22   :  { %s794_s0 = smov 128   ;;  %s795_s9 = smov 8  }
  0x23   :  { %34 = dma.hbm_to_vmem [thread:$0]  %s1169_s1, 4096, %s29_s27, [#allocation6], %s794_s0, %s794_s0, %s795_s9  }
  0x24   :  { %784 = dma.done.wait [#allocation3], 4096  }
  0x25   :  { %785 = vsyncadd [#allocation3], 4294963200 }
  0x26   :  { %786 = dma.done.wait [#allocation6], 4096  }
  0x27   :  { %787 = vsyncadd [#allocation6], 4294963200  ;;  %v844_v0 = vld [vmem:[#allocation2] sm:$0xff]  ;;  %v846_v1 = vld [vmem:[#allocation2 + $0x8] sm:$0xff] }
  0x28   :  { %v848_v2 = vld [vmem:[#allocation2 + $0x10] sm:$0xff]  ;;  %v75_v3 = vadd.f32 %v846_v1, %v844_v0  ;;  %v852_v4 = vld [vmem:[#allocation2 + $0x18] sm:$0xff]  ;;  %v854_v5 = vld [vmem:[#allocation2 + $0x80] sm:$0xff] }
  0x29   :  { %v856_v6 = vld [vmem:[#allocation2 + $0x88] sm:$0xff]  ;;  %v78_v7 = vadd.f32 %v852_v4, %v848_v2  ;;  %v860_v8 = vld [vmem:[#allocation2 + $0x90] sm:$0xff]  ;;  %v862_v9 = vld [vmem:[#allocation2 + $0x98] sm:$0xff] }
  0x2a   :  { %76 = vadd.xlane.f32.xlu0 %v75_v3  ;;  %v99_v10 = vadd.f32 %v856_v6, %v854_v5  ;;  %v102_v11 = vadd.f32 %v862_v9, %v860_v8  ;;  %v868_v12 = vld [vmem:[#allocation2 + $0x20] sm:$0xff]  ;;  %v870_v13 = vld [vmem:[#allocation2 + $0x28] sm:$0xff]  ;;  %v880_v18 = vld [vmem:[#allocation2 + $0x30] sm:$0xff] }
  0x2b   :  { %79 = vadd.xlane.f32.xlu1 %v78_v7  ;;  %v872_v14 = vld [vmem:[#allocation2 + $0xa0] sm:$0xff]  ;;  %v874_v15 = vld [vmem:[#allocation2 + $0xa8] sm:$0xff]  ;;  %v81_v16 = vadd.f32 %v870_v13, %v868_v12  ;;  %v882_v19 = vld [vmem:[#allocation2 + $0x38] sm:$0xff] }
  0x2c   :  { %v105_v17 = vadd.f32 %v874_v15, %v872_v14  ;;  %v884_v20 = vld [vmem:[#allocation2 + $0xb0] sm:$0xff]  ;;  %v886_v21 = vld [vmem:[#allocation2 + $0xb8] sm:$0xff]  ;;  %v84_v22 = vadd.f32 %v882_v19, %v880_v18  ;;  %v892_v24 = vld [vmem:[#allocation2 + $0x40] sm:$0xff] }
  0x2d   :  { %v108_v23 = vadd.f32 %v886_v21, %v884_v20  ;;  %v894_v25 = vld [vmem:[#allocation2 + $0x48] sm:$0xff]  ;;  %v896_v26 = vld [vmem:[#allocation2 + $0xc0] sm:$0xff]  ;;  %v904_v30 = vld [vmem:[#allocation2 + $0x50] sm:$0xff] }
  0x2e   :  { %100 = vadd.xlane.f32.xlu0 %v99_v10  ;;  %v898_v27 = vld [vmem:[#allocation2 + $0xc8] sm:$0xff]  ;;  %v87_v28 = vadd.f32 %v894_v25, %v892_v24  ;;  %v906_v31 = vld [vmem:[#allocation2 + $0x58] sm:$0xff]  ;;  %v908_v32 = vld [vmem:[#allocation2 + $0xd0] sm:$0xff] }
  0x2f   :  { %103 = vadd.xlane.f32.xlu1 %v102_v11  ;;  %v111_v29 = vadd.f32 %v898_v27, %v896_v26  ;;  %v910_v33 = vld [vmem:[#allocation2 + $0xd8] sm:$0xff]  ;;  %v90_v34 = vadd.f32 %v906_v31, %v904_v30  ;;  %v916_v36 = vld [vmem:[#allocation2 + $0x60] sm:$0xff]  ;;  %v918_v37 = vld [vmem:[#allocation2 + $0x68] sm:$0xff] }
  0x30   :  { %v114_v35 = vadd.f32 %v910_v33, %v908_v32  ;;  %v920_v38 = vld [vmem:[#allocation2 + $0xe0] sm:$0xff]  ;;  %v922_v39 = vld [vmem:[#allocation2 + $0xe8] sm:$0xff]  ;;  %v93_v40 = vadd.f32 %v918_v37, %v916_v36  ;;  %v928_v42 = vld [vmem:[#allocation2 + $0x70] sm:$0xff] }
  0x31   :  { %v117_v41 = vadd.f32 %v922_v39, %v920_v38  ;;  %v930_v43 = vld [vmem:[#allocation2 + $0x78] sm:$0xff]  ;;  %v932_v44 = vld [vmem:[#allocation2 + $0xf0] sm:$0xff]  ;;  %v348_v48 = vld [vmem:[#allocation5 + $0x80] sm:$0xff] }
  0x32   :  { %82 = vadd.xlane.f32.xlu0 %v81_v16  ;;  %v934_v45 = vld [vmem:[#allocation2 + $0xf8] sm:$0xff]  ;;  %v96_v46 = vadd.f32 %v930_v43, %v928_v42  ;;  %v349_v49 = vld [vmem:[#allocation5 + $0x88] sm:$0xff]  ;;  %v332_v50 = vld [vmem:[#allocation5] sm:$0xff] }
  0x33   :  { %106 = vadd.xlane.f32.xlu1 %v105_v17  ;;  %v120_v47 = vadd.f32 %v934_v45, %v932_v44  ;;  %v631_v51 = vpack.c.bf16 %v349_v49, %v348_v48  ;;  %v333_v52 = vld [vmem:[#allocation5 + $0x8] sm:$0xff]  ;;  %v350_v53 = vld [vmem:[#allocation5 + $0x90] sm:$0xff]  ;;  %v351_v54 = vld [vmem:[#allocation5 + $0x98] sm:$0xff] }
  0x34   :  { %v633_v55 = vpack.c.bf16 %v333_v52, %v332_v50  ;;  %v635_v56 = vpack.c.bf16 %v351_v54, %v350_v53  ;;  %v334_v57 = vld [vmem:[#allocation5 + $0x10] sm:$0xff]  ;;  %v335_v58 = vld [vmem:[#allocation5 + $0x18] sm:$0xff]  ;;  %v352_v59 = vld [vmem:[#allocation5 + $0xa0] sm:$0xff] }
  0x35   :  { %632 = vmatprep.subr.bf16.mxu0 %v631_v51  ;;  %663 = vmatprep.subr.bf16.mxu1 %v631_v51  ;;  %v353_v60 = vld [vmem:[#allocation5 + $0xa8] sm:$0xff]  ;;  %v637_v61 = vpack.c.bf16 %v335_v58, %v334_v57  ;;  %v336_v63 = vld [vmem:[#allocation5 + $0x20] sm:$0xff]  ;;  %v354_v7 = vld [vmem:[#allocation5 + $0xb0] sm:$0xff] }
  0x36   :  { %85 = vadd.xlane.f32.xlu0 %v84_v22  ;;  %634 = vmatpush3.bf16.msra.mxu0 %v633_v55  ;;  %v639_v62 = vpack.c.bf16 %v353_v60, %v352_v59  ;;  %v337_v3 = vld [vmem:[#allocation5 + $0x28] sm:$0xff]  ;;  %v355_v10 = vld [vmem:[#allocation5 + $0xb8] sm:$0xff]  ;;  %v338_v17 = vld [vmem:[#allocation5 + $0x30] sm:$0xff] }
  0x37   :  { %109 = vadd.xlane.f32.xlu1 %v108_v23  ;;  %671 = vmatpush3.bf16.msra.mxu1 %v633_v55  ;;  %v641_v11 = vpack.c.bf16 %v337_v3, %v336_v63  ;;  %v643_v16 = vpack.c.bf16 %v355_v10, %v354_v7  ;;  %v339_v22 = vld [vmem:[#allocation5 + $0x38] sm:$0xff] }
  0x38   :  { %636 = vmatprep.subr.bf16.mxu0 %v635_v56  ;;  %664 = vmatprep.subr.bf16.mxu1 %v635_v56  ;;  %v645_v23 = vpack.c.bf16 %v339_v22, %v338_v17 }
  0x3a   :  { %88 = vadd.xlane.f32.xlu0 %v87_v28  ;;  %638 = vmatpush3.bf16.msra.mxu0 %v637_v61 }
  0x3b   :  { %112 = vadd.xlane.f32.xlu1 %v111_v29  ;;  %672 = vmatpush3.bf16.msra.mxu1 %v637_v61 }
  0x3c   :  { %640 = vmatprep.subr.bf16.mxu0 %v639_v62  ;;  %665 = vmatprep.subr.bf16.mxu1 %v639_v62 }
  0x3e   :  { %91 = vadd.xlane.f32.xlu0 %v90_v34  ;;  %642 = vmatpush3.bf16.msra.mxu0 %v641_v11 }
  0x3f   :  { %115 = vadd.xlane.f32.xlu1 %v114_v35  ;;  %673 = vmatpush3.bf16.msra.mxu1 %v641_v11 }
  0x40   :  { %644 = vmatprep.subr.bf16.mxu0 %v643_v16  ;;  %666 = vmatprep.subr.bf16.mxu1 %v643_v16 }
  0x42   :  { %94 = vadd.xlane.f32.xlu0 %v93_v40  ;;  %646 = vmatpush3.bf16.msra.mxu0 %v645_v23 }
  0x43   :  { %118 = vadd.xlane.f32.xlu1 %v117_v41  ;;  %674 = vmatpush3.bf16.msra.mxu1 %v645_v23 }
  0x46   :  { %97 = vadd.xlane.f32.xlu0 %v96_v46 }
  0x47   :  { %121 = vadd.xlane.f32.xlu1 %v120_v47 }
  0xb7   :  { %v77_v28 = vpop.xlane.xlu0 %76 }
  0xb8   :  { %v124_v29 = vmul.f32 0.00390625, %v77_v28  ;;  %v80_v34 = vpop.xlane.xlu1 %79 }
  0xb9   :  { %v125_v35 = vmul.f32 0.00390625, %v80_v34 }
  0xba   :  { %v941_v40 = vsub.f32 %v844_v0, %v124_v29  ;;  %v944_v41 = vsub.f32 %v846_v1, %v124_v29 }
  0xbb   :  { %v947_v46 = vsub.f32 %v848_v2, %v125_v35  ;;  %v950_v47 = vsub.f32 %v852_v4, %v125_v35  ;;  %v101_v48 = vpop.xlane.xlu0 %100 }
  0xbc   :  { %v132_v49 = vmul.f32 0.00390625, %v101_v48  ;;  %v104_v50 = vpop.xlane.xlu1 %103  ;;  %v172_v51 = vmul.f32 %v941_v40, %v941_v40  ;;  %v173_v52 = vmul.f32 %v944_v41, %v944_v41 }
  0xbd   :  { %v133_v0 = vmul.f32 0.00390625, %v104_v50  ;;  %v174_v1 = vmul.f32 %v947_v46, %v947_v46  ;;  %v175_v2 = vmul.f32 %v950_v47, %v950_v47 }
  0xbe   :  { %v961_v53 = vsub.f32 %v854_v5, %v132_v49  ;;  %v964_v4 = vsub.f32 %v856_v6, %v132_v49  ;;  %v204_v54 = vadd.f32 %v173_v52, %v172_v51 }
  0xbf   :  { %v967_v55 = vsub.f32 %v860_v8, %v133_v0  ;;  %v970_v56 = vsub.f32 %v862_v9, %v133_v0  ;;  %v83_v57 = vpop.xlane.xlu0 %82  ;;  %v207_v60 = vadd.f32 %v175_v2, %v174_v1 }
  0xc0   :  { %v126_v58 = vmul.f32 0.00390625, %v83_v57  ;;  %205 = vadd.xlane.f32.xlu0 %v204_v54  ;;  %v107_v59 = vpop.xlane.xlu1 %106  ;;  %v188_v61 = vmul.f32 %v961_v53, %v961_v53  ;;  %v189_v5 = vmul.f32 %v964_v4, %v964_v4 }
  0xc1   :  { %v134_v6 = vmul.f32 0.00390625, %v107_v59  ;;  %v190_v62 = vmul.f32 %v967_v55, %v967_v55  ;;  %v191_v8 = vmul.f32 %v970_v56, %v970_v56 }
  0xc2   :  { %v981_v9 = vsub.f32 %v868_v12, %v126_v58  ;;  %v984_v63 = vsub.f32 %v870_v13, %v126_v58  ;;  %v228_v3 = vadd.f32 %v189_v5, %v188_v61 }
  0xc3   :  { %v987_v7 = vsub.f32 %v872_v14, %v134_v6  ;;  %v990_v10 = vsub.f32 %v874_v15, %v134_v6  ;;  %v86_v11 = vpop.xlane.xlu0 %85  ;;  %v231_v22 = vadd.f32 %v191_v8, %v190_v62  ;;  %v356_v62 = vld [vmem:[#allocation5 + $0xc0] sm:$0xff]  ;;  %v357_v8 = vld [vmem:[#allocation5 + $0xc8] sm:$0xff] }
  0xc4   :  { %v127_v16 = vmul.f32 0.00390625, %v86_v11  ;;  %208 = vadd.xlane.f32.xlu0 %v207_v60  ;;  %229 = vadd.xlane.f32.xlu1 %v228_v3  ;;  %v110_v17 = vpop.xlane.xlu1 %109  ;;  %v176_v12 = vmul.f32 %v981_v9, %v981_v9  ;;  %v177_v13 = vmul.f32 %v984_v63, %v984_v63 }
  0xc5   :  { %v135_v23 = vmul.f32 0.00390625, %v110_v17  ;;  %v192_v14 = vmul.f32 %v987_v7, %v987_v7  ;;  %v193_v15 = vmul.f32 %v990_v10, %v990_v10  ;;  %v647_v17 = vpack.c.bf16 %v357_v8, %v356_v62 }
  0xc6   :  { %v1001_v28 = vsub.f32 %v880_v18, %v127_v16  ;;  %v1004_v29 = vsub.f32 %v882_v19, %v127_v16  ;;  %v210_v34 = vadd.f32 %v177_v13, %v176_v12  ;;  %v341_v12 = vld [vmem:[#allocation5 + $0x48] sm:$0xff] }
  0xc7   :  { %v1007_v35 = vsub.f32 %v884_v20, %v135_v23  ;;  %v1010_v48 = vsub.f32 %v886_v21, %v135_v23  ;;  %v89_v49 = vpop.xlane.xlu0 %88  ;;  %v234_v52 = vadd.f32 %v193_v15, %v192_v14  ;;  %648 = vmatprep.subr.bf16.mxu0 %v647_v17  ;;  %667 = vmatprep.subr.bf16.mxu1 %v647_v17  ;;  %v360_v17 = vld [vmem:[#allocation5 + $0xe0] sm:$0xff] }
  0xc8   :  { %v128_v50 = vmul.f32 0.00390625, %v89_v49  ;;  %232 = vadd.xlane.f32.xlu1 %v231_v22  ;;  %211 = vadd.xlane.f32.xlu0 %v210_v34  ;;  %v113_v51 = vpop.xlane.xlu1 %112  ;;  %v178_v18 = vmul.f32 %v1001_v28, %v1001_v28  ;;  %v179_v19 = vmul.f32 %v1004_v29, %v1004_v29  ;;  %v340_v22 = vld [vmem:[#allocation5 + $0x40] sm:$0xff] }
  0xc9   :  { %v136_v0 = vmul.f32 0.00390625, %v113_v51  ;;  %v194_v20 = vmul.f32 %v1007_v35, %v1007_v35  ;;  %v195_v21 = vmul.f32 %v1010_v48, %v1010_v48  ;;  %v649_v15 = vpack.c.bf16 %v341_v12, %v340_v22  ;;  %v361_v22 = vld [vmem:[#allocation5 + $0xe8] sm:$0xff] }
  0xca   :  { %v1021_v1 = vsub.f32 %v892_v24, %v128_v50  ;;  %v1024_v2 = vsub.f32 %v894_v25, %v128_v50  ;;  %v213_v54 = vadd.f32 %v179_v19, %v178_v18 }
  0xcb   :  { %v1027_v57 = vsub.f32 %v896_v26, %v136_v0  ;;  %v1030_v58 = vsub.f32 %v898_v27, %v136_v0  ;;  %v92_v59 = vpop.xlane.xlu0 %91  ;;  %v237_v5 = vadd.f32 %v195_v21, %v194_v20  ;;  %650 = vmatpush3.bf16.msra.mxu0 %v649_v15  ;;  %v358_v0 = vld [vmem:[#allocation5 + $0xd0] sm:$0xff]  ;;  %v359_v20 = vld [vmem:[#allocation5 + $0xd8] sm:$0xff]  ;;  %675 = vmatpush3.bf16.msra.mxu1 %v649_v15 }
  0xcc   :  { %v129_v60 = vmul.f32 0.00390625, %v92_v59  ;;  %235 = vadd.xlane.f32.xlu1 %v234_v52  ;;  %214 = vadd.xlane.f32.xlu0 %v213_v54  ;;  %v116_v61 = vpop.xlane.xlu1 %115  ;;  %v180_v24 = vmul.f32 %v1021_v1, %v1021_v1  ;;  %v181_v25 = vmul.f32 %v1024_v2, %v1024_v2 }
  0xcd   :  { %v137_v6 = vmul.f32 0.00390625, %v116_v61  ;;  %v196_v26 = vmul.f32 %v1027_v57, %v1027_v57  ;;  %v197_v27 = vmul.f32 %v1030_v58, %v1030_v58  ;;  %v651_v61 = vpack.c.bf16 %v359_v20, %v358_v0  ;;  %v347_v0 = vld [vmem:[#allocation5 + $0x78] sm:$0xff] }
  0xce   :  { %v1041_v3 = vsub.f32 %v904_v30, %v129_v60  ;;  %v1044_v11 = vsub.f32 %v906_v31, %v129_v60  ;;  %v216_v16 = vadd.f32 %v181_v25, %v180_v24 }
  0xcf   :  { %v1047_v13 = vsub.f32 %v908_v32, %v137_v6  ;;  %v1050_v23 = vsub.f32 %v910_v33, %v137_v6  ;;  %v95_v14 = vpop.xlane.xlu0 %94  ;;  %v240_v49 = vadd.f32 %v197_v27, %v196_v26  ;;  %652 = vmatprep.subr.bf16.mxu0 %v651_v61  ;;  %668 = vmatprep.subr.bf16.mxu1 %v651_v61 }
  0xd0   :  { %v130_v34 = vmul.f32 0.00390625, %v95_v14  ;;  %238 = vadd.xlane.f32.xlu1 %v237_v5  ;;  %217 = vadd.xlane.f32.xlu0 %v216_v16  ;;  %v119_v30 = vpop.xlane.xlu1 %118  ;;  %v182_v31 = vmul.f32 %v1041_v3, %v1041_v3  ;;  %v183_v50 = vmul.f32 %v1044_v11, %v1044_v11  ;;  %v342_v5 = vld [vmem:[#allocation5 + $0x50] sm:$0xff] }
  0xd1   :  { %v138_v51 = vmul.f32 0.00390625, %v119_v30  ;;  %v198_v32 = vmul.f32 %v1047_v13, %v1047_v13  ;;  %v199_v33 = vmul.f32 %v1050_v23, %v1050_v23  ;;  %v344_v30 = vld [vmem:[#allocation5 + $0x60] sm:$0xff] }
  0xd2   :  { %v1061_v52 = vsub.f32 %v916_v36, %v130_v34  ;;  %v1064_v18 = vsub.f32 %v918_v37, %v130_v34  ;;  %v219_v19 = vadd.f32 %v183_v50, %v182_v31  ;;  %v343_v36 = vld [vmem:[#allocation5 + $0x58] sm:$0xff]  ;;  %v655_v34 = vpack.c.bf16 %v361_v22, %v360_v17 }
  0xd3   :  { %v1067_v21 = vsub.f32 %v920_v38, %v138_v51  ;;  %v1070_v54 = vsub.f32 %v922_v39, %v138_v51  ;;  %v98_v59 = vpop.xlane.xlu0 %97  ;;  %v243_v60 = vadd.f32 %v199_v33, %v198_v32  ;;  %v653_v38 = vpack.c.bf16 %v343_v36, %v342_v5  ;;  %v362_v51 = vld [vmem:[#allocation5 + $0xf0] sm:$0xff]  ;;  %v363_v32 = vld [vmem:[#allocation5 + $0xf8] sm:$0xff] }
  0xd4   :  { %v131_v24 = vmul.f32 0.00390625, %v98_v59  ;;  %241 = vadd.xlane.f32.xlu1 %v240_v49  ;;  %220 = vadd.xlane.f32.xlu0 %v219_v19  ;;  %v122_v37 = vpop.xlane.xlu1 %121  ;;  %v184_v25 = vmul.f32 %v1061_v52, %v1061_v52  ;;  %v185_v6 = vmul.f32 %v1064_v18, %v1064_v18  ;;  %v345_v49 = vld [vmem:[#allocation5 + $0x68] sm:$0xff]  ;;  %v659_v33 = vpack.c.bf16 %v363_v32, %v362_v51  ;;  %v346_v19 = vld [vmem:[#allocation5 + $0x70] sm:$0xff] }
  0xd5   :  { %v139_v26 = vmul.f32 0.00390625, %v122_v37  ;;  %v200_v39 = vmul.f32 %v1067_v21, %v1067_v21  ;;  %v201_v27 = vmul.f32 %v1070_v54, %v1070_v54  ;;  %654 = vmatpush3.bf16.msra.mxu0 %v653_v38  ;;  %676 = vmatpush3.bf16.msra.mxu1 %v653_v38  ;;  %v657_v31 = vpack.c.bf16 %v345_v49, %v344_v30 }
  0xd6   :  { %v1081_v62 = vsub.f32 %v928_v42, %v131_v24  ;;  %v1084_v8 = vsub.f32 %v930_v43, %v131_v24  ;;  %v222_v16 = vadd.f32 %v185_v6, %v184_v25  ;;  %656 = vmatprep.subr.bf16.mxu0 %v655_v34  ;;  %669 = vmatprep.subr.bf16.mxu1 %v655_v34 }
  0xd7   :  { %v1087_v12 = vsub.f32 %v932_v44, %v139_v26  ;;  %v1090_v14 = vsub.f32 %v934_v45, %v139_v26  ;;  %v246_v15 = vadd.f32 %v201_v27, %v200_v39  ;;  %v661_v59 = vpack.c.bf16 %v347_v0, %v346_v19 }
  0xd8   :  { %244 = vadd.xlane.f32.xlu1 %v243_v60  ;;  %223 = vadd.xlane.f32.xlu0 %v222_v16  ;;  %v186_v42 = vmul.f32 %v1081_v62, %v1081_v62  ;;  %v187_v43 = vmul.f32 %v1084_v8, %v1084_v8 }
  0xd9   :  { %v202_v44 = vmul.f32 %v1087_v12, %v1087_v12  ;;  %v203_v45 = vmul.f32 %v1090_v14, %v1090_v14  ;;  %658 = vmatpush3.bf16.msra.mxu0 %v657_v31  ;;  %677 = vmatpush3.bf16.msra.mxu1 %v657_v31 }
  0xda   :  { %v225_v50 = vadd.f32 %v187_v43, %v186_v42  ;;  %660 = vmatprep.subr.bf16.mxu0 %v659_v33  ;;  %670 = vmatprep.subr.bf16.mxu1 %v659_v33 }
  0xdb   :  { %v249_v20 = vadd.f32 %v203_v45, %v202_v44 }
  0xdc   :  { %247 = vadd.xlane.f32.xlu1 %v246_v15  ;;  %226 = vadd.xlane.f32.xlu0 %v225_v50 }
  0xdd   :  { %662 = vmatpush3.bf16.msra.mxu0 %v661_v59  ;;  %678 = vmatpush3.bf16.msra.mxu1 %v661_v59 }
  0xe0   :  { %250 = vadd.xlane.f32.xlu1 %v249_v20 }
 0x14d   :  { %v206_v60 = vpop.xlane.xlu0 %205 }
 0x14e   :  { %v252_v61 = vmul.f32 0.00390625, %v206_v60 }
 0x150   :  { %v268_v5 = vadd.f32 1e-05, %v252_v61 }
 0x151   :  { %v230_v36 = vpop.xlane.xlu1 %229  ;;  %v209_v24 = vpop.xlane.xlu0 %208 }
 0x152   :  { %686 = vrsqrt.f32 %v268_v5  ;;  %v260_v37 = vmul.f32 0.00390625, %v230_v36  ;;  %v253_v25 = vmul.f32 0.00390625, %v209_v24 }
 0x154   :  { %v276_v6 = vadd.f32 1e-05, %v260_v37  ;;  %v269_v38 = vadd.f32 1e-05, %v253_v25 }
 0x155   :  { %v233_v26 = vpop.xlane.xlu1 %232  ;;  %v212_v39 = vpop.xlane.xlu0 %211 }
 0x156   :  { %688 = vrsqrt.f32 %v276_v6  ;;  %v261_v27 = vmul.f32 0.00390625, %v233_v26  ;;  %v254_v16 = vmul.f32 0.00390625, %v212_v39 }
 0x157   :  { %690 = vrsqrt.f32 %v269_v38 }
 0x158   :  { %v277_v17 = vadd.f32 1e-05, %v261_v27  ;;  %v270_v22 = vadd.f32 1e-05, %v254_v16 }
 0x159   :  { %v236_v15 = vpop.xlane.xlu1 %235  ;;  %v215_v34 = vpop.xlane.xlu0 %214 }
 0x15a   :  { %692 = vrsqrt.f32 %v277_v17  ;;  %v262_v30 = vmul.f32 0.00390625, %v236_v15  ;;  %v255_v49 = vmul.f32 0.00390625, %v215_v34 }
 0x15b   :  { %694 = vrsqrt.f32 %v270_v22 }
 0x15c   :  { %v687_v42 = vpop.eup %686  ;;  %v278_v43 = vadd.f32 1e-05, %v262_v30  ;;  %v271_v31 = vadd.f32 1e-05, %v255_v49 }
 0x15d   :  { %v239_v44 = vpop.xlane.xlu1 %238  ;;  %v218_v45 = vpop.xlane.xlu0 %217  ;;  %v301_v50 = vmul.f32 %v687_v42, %v944_v41  ;;  %v300_v51 = vmul.f32 %v687_v42, %v941_v40 }
 0x15e   :  { %696 = vrsqrt.f32 %v278_v43  ;;  %v263_v32 = vmul.f32 0.00390625, %v239_v44  ;;  %v256_v33 = vmul.f32 0.00390625, %v218_v45 }
 0x15f   :  { %698 = vrsqrt.f32 %v271_v31  ;;  %435 = vmatprep.mubr.f32.mxu0 %v301_v50 }
 0x160   :  { %v689_v19 = vpop.eup %688  ;;  %v279_v0 = vadd.f32 1e-05, %v263_v32  ;;  %v272_v20 = vadd.f32 1e-05, %v256_v33  ;;  %436 = vmatmul.mubr.f32.vlgmr.msra.gmra.mrb[0].mxu0 %v300_v51 }
 0x161   :  { %v691_v59 = vpop.eup %690  ;;  %v242_v60 = vpop.xlane.xlu1 %241  ;;  %v317_v5 = vmul.f32 %v689_v19, %v964_v4  ;;  %v316_v36 = vmul.f32 %v689_v19, %v961_v53 }
 0x162   :  { %v221_v61 = vpop.xlane.xlu0 %220  ;;  %700 = vrsqrt.f32 %v279_v0  ;;  %v264_v41 = vmul.f32 0.00390625, %v242_v60  ;;  %v303_v40 = vmul.f32 %v691_v59, %v950_v47  ;;  %v302_v37 = vmul.f32 %v691_v59, %v947_v46 }
 0x163   :  { %v257_v24 = vmul.f32 0.00390625, %v221_v61  ;;  %702 = vrsqrt.f32 %v272_v20  ;;  %475 = vmatprep.mubr.f32.mxu1 %v317_v5 }
 0x164   :  { %v693_v25 = vpop.eup %692  ;;  %v280_v6 = vadd.f32 1e-05, %v264_v41  ;;  %440 = vmatprep.mubr.f32.mxu0 %v303_v40  ;;  %476 = vmatmul.mubr.f32.vlgmr.msra.gmra.mrb[0].mxu1 %v316_v36 }
 0x165   :  { %v273_v38 = vadd.f32 1e-05, %v257_v24  ;;  %v695_v26 = vpop.eup %694  ;;  %441 = vmatmul.mubr.f32.gmra.mrb[2].mxu0 %v302_v37  ;;  %v245_v39 = vpop.xlane.xlu1 %244  ;;  %v319_v53 = vmul.f32 %v693_v25, %v970_v56  ;;  %v318_v27 = vmul.f32 %v693_v25, %v967_v55 }
 0x166   :  { %v224_v4 = vpop.xlane.xlu0 %223  ;;  %704 = vrsqrt.f32 %v280_v6  ;;  %v265_v16 = vmul.f32 0.00390625, %v245_v39  ;;  %v305_v17 = vmul.f32 %v695_v26, %v984_v63  ;;  %v304_v46 = vmul.f32 %v695_v26, %v981_v9 }
 0x167   :  { %v258_v47 = vmul.f32 0.00390625, %v224_v4  ;;  %706 = vrsqrt.f32 %v273_v38  ;;  %480 = vmatprep.mubr.f32.mxu1 %v319_v53 }
 0x168   :  { %v697_v22 = vpop.eup %696  ;;  %v281_v15 = vadd.f32 1e-05, %v265_v16  ;;  %445 = vmatprep.mubr.f32.mxu0 %v305_v17  ;;  %481 = vmatmul.mubr.f32.gmra.mrb[2].mxu1 %v318_v27 }
 0x169   :  { %v274_v34 = vadd.f32 1e-05, %v258_v47  ;;  %v699_v30 = vpop.eup %698  ;;  %446 = vmatmul.mubr.f32.gmra.mrb[4].mxu0 %v304_v46  ;;  %v248_v49 = vpop.xlane.xlu1 %247  ;;  %v321_v55 = vmul.f32 %v697_v22, %v990_v10  ;;  %v320_v42 = vmul.f32 %v697_v22, %v987_v7 }
 0x16a   :  { %v227_v56 = vpop.xlane.xlu0 %226  ;;  %708 = vrsqrt.f32 %v281_v15  ;;  %v266_v43 = vmul.f32 0.00390625, %v248_v49  ;;  %v307_v31 = vmul.f32 %v699_v30, %v1004_v29  ;;  %v306_v9 = vmul.f32 %v699_v30, %v1001_v28 }
 0x16b   :  { %v259_v63 = vmul.f32 0.00390625, %v227_v56  ;;  %710 = vrsqrt.f32 %v274_v34  ;;  %485 = vmatprep.mubr.f32.mxu1 %v321_v55 }
 0x16c   :  { %v701_v44 = vpop.eup %700  ;;  %v282_v45 = vadd.f32 1e-05, %v266_v43  ;;  %450 = vmatprep.mubr.f32.mxu0 %v307_v31  ;;  %486 = vmatmul.mubr.f32.gmra.mrb[4].mxu1 %v320_v42 }
 0x16d   :  { %v275_v50 = vadd.f32 1e-05, %v259_v63  ;;  %v703_v51 = vpop.eup %702  ;;  %451 = vmatmul.mubr.f32.gmra.mrb[6].mxu0 %v306_v9  ;;  %v251_v32 = vpop.xlane.xlu1 %250  ;;  %v323_v10 = vmul.f32 %v701_v44, %v1010_v48  ;;  %v322_v7 = vmul.f32 %v701_v44, %v1007_v35 }
 0x16e   :  { %712 = vrsqrt.f32 %v282_v45  ;;  %v267_v33 = vmul.f32 0.00390625, %v251_v32  ;;  %v309_v29 = vmul.f32 %v703_v51, %v1024_v2  ;;  %v308_v19 = vmul.f32 %v703_v51, %v1021_v1 }
 0x16f   :  { %714 = vrsqrt.f32 %v275_v50  ;;  %490 = vmatprep.mubr.f32.mxu1 %v323_v10 }
 0x170   :  { %v705_v28 = vpop.eup %704  ;;  %v283_v0 = vadd.f32 1e-05, %v267_v33  ;;  %455 = vmatprep.mubr.f32.mxu0 %v309_v29  ;;  %491 = vmatmul.mubr.f32.gmra.mrb[6].mxu1 %v322_v7 }
 0x171   :  { %v707_v20 = vpop.eup %706  ;;  %456 = vmatmul.mubr.f32.gmra.mrb[8].mxu0 %v308_v19  ;;  %v325_v59 = vmul.f32 %v705_v28, %v1030_v58  ;;  %v324_v48 = vmul.f32 %v705_v28, %v1027_v57 }
 0x172   :  { %716 = vrsqrt.f32 %v283_v0  ;;  %v311_v35 = vmul.f32 %v707_v20, %v1044_v11  ;;  %v310_v60 = vmul.f32 %v707_v20, %v1041_v3 }
 0x173   :  { %495 = vmatprep.mubr.f32.mxu1 %v325_v59 }
 0x174   :  { %v709_v2 = vpop.eup %708  ;;  %460 = vmatprep.mubr.f32.mxu0 %v311_v35  ;;  %496 = vmatmul.mubr.f32.gmra.mrb[8].mxu1 %v324_v48 }
 0x175   :  { %v711_v1 = vpop.eup %710  ;;  %461 = vmatmul.mubr.f32.gmra.mrb[10].mxu0 %v310_v60  ;;  %v327_v61 = vmul.f32 %v709_v2, %v1050_v23  ;;  %v326_v5 = vmul.f32 %v709_v2, %v1047_v13 }
 0x176   :  { %v313_v36 = vmul.f32 %v711_v1, %v1064_v18  ;;  %v312_v58 = vmul.f32 %v711_v1, %v1061_v52 }
 0x177   :  { %500 = vmatprep.mubr.f32.mxu1 %v327_v61 }
 0x178   :  { %v713_v57 = vpop.eup %712  ;;  %465 = vmatprep.mubr.f32.mxu0 %v313_v36  ;;  %501 = vmatmul.mubr.f32.gmra.mrb[10].mxu1 %v326_v5 }
 0x179   :  { %v715_v11 = vpop.eup %714  ;;  %466 = vmatmul.mubr.f32.gmra.mrb[12].mxu0 %v312_v58  ;;  %v329_v3 = vmul.f32 %v713_v57, %v1070_v54  ;;  %v328_v41 = vmul.f32 %v713_v57, %v1067_v21  ;;  %v1135_v21 = vld [vmem:[%s1170_s2] ss:$0 sm:$0xff]  ;;  %s796_s2 = smov [#allocation7]  }
 0x17a   :  { %v315_v24 = vmul.f32 %v715_v11, %v1084_v8  ;;  %v314_v23 = vmul.f32 %v715_v11, %v1081_v62  ;;  %s537_s13 = sshll.u32 %s796_s2, 4  ;;  %s538_s13 = int_to_ptr.vmem [resolvable:$true] %s537_s13 }
 0x17b   :  { %505 = vmatprep.mubr.f32.mxu1 %v329_v3  ;;  %s762_s14 = scalar_lea.vmem %s538_s13, 2048  ;;  %p767_p3 = scmp.lt.s32.totalorder %s538_s13, %s538_s13 }
 0x17c   :  { %v717_v13 = vpop.eup %716  ;;  %470 = vmatprep.mubr.f32.mxu0 %v315_v24  ;;  %506 = vmatmul.mubr.f32.gmra.mrb[12].mxu1 %v328_v41  ;;  %p763_p2 = scmp.ne.s32.totalorder %s538_s13, %s762_s14  ;;  %p768_p4 = scmp.lt.s32.totalorder %s762_s14, %s762_s14 }
 0x17d   :  { %471 = vmatmul.mubr.f32.gmra.mrb[14].mxu0 %v314_v23  ;;  %v331_v52 = vmul.f32 %v717_v13, %v1090_v14  ;;  %v330_v18 = vmul.f32 %v717_v13, %v1087_v12 }
 0x17e   :  { %p769_p5 = por %p768_p4, %p767_p3 }
 0x17f   :  { %510 = vmatprep.mubr.f32.mxu1 %v331_v52 }
 0x180   :  { %511 = vmatmul.mubr.f32.gmra.mrb[14].mxu1 %v330_v18  ;;  %p770_p6 = pnand %p769_p5, %p763_p2 }
 0x233   :  { %v583_v40 = vpop.f32.mrb[0].mxu0 }
 0x234   :  { %v584_v54 = vpop.f32.mrb[1].mxu0 }
 0x235   :  { %v585_v8 = vadd.f32 %v584_v54, %v583_v40 }
 0x237   :  { %v438_v62 = vadd.f32 %v585_v8, %v1135_v21  ;;  %v607_v37 = vpop.f32.mrb[0].mxu1 }
 0x238   :  { %v586_v25 = vpop.f32.mrb[2].mxu0  ;;  %v608_v6 = vpop.f32.mrb[1].mxu1 }
 0x239   :  { %516 = vst [vmem:[#allocation7] sm:$0xff] %v438_v62  ;;  %v587_v38 = vpop.f32.mrb[3].mxu0  ;;  %v609_v14 = vadd.f32 %v608_v6, %v607_v37 }
 0x23a   :  { %v588_v26 = vadd.f32 %v587_v38, %v586_v25 }
 0x23b   :  { %v478_v12 = vadd.f32 %v609_v14, %v1135_v21  ;;  %v610_v39 = vpop.f32.mrb[2].mxu1 }
 0x23c   :  { %v443_v4 = vadd.f32 %v588_v26, %v1135_v21  ;;  %v589_v53 = vpop.f32.mrb[4].mxu0  ;;  %v611_v27 = vpop.f32.mrb[3].mxu1 }
 0x23d   :  { %524 = vst [vmem:[#allocation7 + $0x40] sm:$0xff] %v478_v12  ;;  %v590_v16 = vpop.f32.mrb[5].mxu0  ;;  %v612_v47 = vadd.f32 %v611_v27, %v610_v39 }
 0x23e   :  { %517 = vst [vmem:[#allocation7 + $0x8] sm:$0xff] %v443_v4  ;;  %v591_v17 = vadd.f32 %v590_v16, %v589_v53 }
 0x23f   :  { %v483_v46 = vadd.f32 %v612_v47, %v1135_v21  ;;  %v613_v22 = vpop.f32.mrb[4].mxu1 }
 0x240   :  { %v448_v15 = vadd.f32 %v591_v17, %v1135_v21  ;;  %v592_v34 = vpop.f32.mrb[6].mxu0  ;;  %v614_v30 = vpop.f32.mrb[5].mxu1 }
 0x241   :  { %525 = vst [vmem:[#allocation7 + $0x48] sm:$0xff] %v483_v46  ;;  %v593_v49 = vpop.f32.mrb[7].mxu0  ;;  %v615_v56 = vadd.f32 %v614_v30, %v613_v22 }
 0x242   :  { %518 = vst [vmem:[#allocation7 + $0x10] sm:$0xff] %v448_v15  ;;  %v594_v55 = vadd.f32 %v593_v49, %v592_v34 }
 0x243   :  { %v488_v42 = vadd.f32 %v615_v56, %v1135_v21  ;;  %v616_v43 = vpop.f32.mrb[6].mxu1 }
 0x244   :  { %v453_v63 = vadd.f32 %v594_v55, %v1135_v21  ;;  %v595_v31 = vpop.f32.mrb[8].mxu0  ;;  %v617_v9 = vpop.f32.mrb[7].mxu1 }
 0x245   :  { %526 = vst [vmem:[#allocation7 + $0x50] sm:$0xff] %v488_v42  ;;  %v596_v44 = vpop.f32.mrb[9].mxu0  ;;  %v618_v45 = vadd.f32 %v617_v9, %v616_v43 }
 0x246   :  { %519 = vst [vmem:[#allocation7 + $0x18] sm:$0xff] %v453_v63  ;;  %v597_v50 = vadd.f32 %v596_v44, %v595_v31 }
 0x247   :  { %v493_v51 = vadd.f32 %v618_v45, %v1135_v21  ;;  %v619_v32 = vpop.f32.mrb[8].mxu1 }
 0x248   :  { %v458_v10 = vadd.f32 %v597_v50, %v1135_v21  ;;  %v598_v7 = vpop.f32.mrb[10].mxu0  ;;  %v620_v33 = vpop.f32.mrb[9].mxu1 }
 0x249   :  { %527 = vst [vmem:[#allocation7 + $0x58] sm:$0xff] %v493_v51  ;;  %v599_v29 = vpop.f32.mrb[11].mxu0  ;;  %v621_v19 = vadd.f32 %v620_v33, %v619_v32 }
 0x24a   :  { %520 = vst [vmem:[#allocation7 + $0x20] sm:$0xff] %v458_v10  ;;  %v600_v28 = vadd.f32 %v599_v29, %v598_v7 }
 0x24b   :  { %v498_v0 = vadd.f32 %v621_v19, %v1135_v21  ;;  %v622_v20 = vpop.f32.mrb[10].mxu1 }
 0x24c   :  { %v463_v59 = vadd.f32 %v600_v28, %v1135_v21  ;;  %v601_v48 = vpop.f32.mrb[12].mxu0  ;;  %v623_v35 = vpop.f32.mrb[11].mxu1 }
 0x24d   :  { %528 = vst [vmem:[#allocation7 + $0x60] sm:$0xff] %v498_v0  ;;  %v602_v60 = vpop.f32.mrb[13].mxu0  ;;  %v624_v2 = vadd.f32 %v623_v35, %v622_v20 }
 0x24e   :  { %521 = vst [vmem:[#allocation7 + $0x28] sm:$0xff] %v463_v59  ;;  %v603_v1 = vadd.f32 %v602_v60, %v601_v48 }
 0x24f   :  { %v503_v61 = vadd.f32 %v624_v2, %v1135_v21  ;;  %v625_v5 = vpop.f32.mrb[12].mxu1 }
 0x250   :  { %v468_v36 = vadd.f32 %v603_v1, %v1135_v21  ;;  %v604_v58 = vpop.f32.mrb[14].mxu0  ;;  %v626_v57 = vpop.f32.mrb[13].mxu1 }
 0x251   :  { %529 = vst [vmem:[#allocation7 + $0x68] sm:$0xff] %v503_v61  ;;  %v605_v11 = vpop.f32.mrb[15].mxu0  ;;  %v627_v3 = vadd.f32 %v626_v57, %v625_v5 }
 0x252   :  { %522 = vst [vmem:[#allocation7 + $0x30] sm:$0xff] %v468_v36  ;;  %v606_v41 = vadd.f32 %v605_v11, %v604_v58 }
 0x253   :  { %v508_v24 = vadd.f32 %v627_v3, %v1135_v21  ;;  %v628_v23 = vpop.f32.mrb[14].mxu1 }
 0x254   :  { %v473_v13 = vadd.f32 %v606_v41, %v1135_v21  ;;  %v629_v52 = vpop.f32.mrb[15].mxu1 }
 0x255   :  { %530 = vst [vmem:[#allocation7 + $0x70] sm:$0xff] %v508_v24  ;;  %v630_v18 = vadd.f32 %v629_v52, %v628_v23 }
 0x256   :  { %523 = vst [vmem:[#allocation7 + $0x38] sm:$0xff] %v473_v13 }
 0x257   :  { %v513_v40 = vadd.f32 %v630_v18, %v1135_v21 }
 0x259   :  { %531 = vst [vmem:[#allocation7 + $0x78] sm:$0xff] %v513_v40 }
 0x25a   :  { %773 = shalt.err (!%p770_p6)
}
 0x25b   :  { %s774_s17 = scalar_lea.hbm %s1171_s3, 2048 }
 0x25c   :  { %p775_p7 = scmp.ne.s32.totalorder %s1171_s3, %s774_s17  ;;  %p778_p8 = scmp.lt.u32.totalorder %s774_s17, %s1171_s3 }
 0x25e   :  { %p780_p9 = pnand %p778_p8, %p775_p7 }
 0x260   :  { %783 = shalt.err (!%p780_p9)
}
 0x261   :  { %543 = dma.vmem_to_hbm [thread:$0]  %s538_s13, 2048, %s1171_s3, [#allocation4], %s794_s0, %s794_s0, %s795_s9  }
 0x262   :  { %788 = dma.done.wait [#allocation4], 2048  }
 0x263   :  { %789 = vsyncadd [#allocation4], 4294965248 }
 0x264   :  { %547 = vsyncpa [#allocation3], 1 }
 0x265   :  { %548 = vsyncpa [#allocation6], 1 }
 0x266   :  { %549 = vsyncpa [#allocation4], 1 }

</bundles_post_ra>
